<compile_context>
chip_gen: v7x
topology: tpu7x:2x2x1
jax: 0.10.0
libtpu: 0.0.40
codegen_flags: <defaults>
</compile_context>

<pallas_src>
import jax
import jax.numpy as jnp
from jax.experimental import pallas as pl
from jax.experimental.pallas import tpu as pltpu


def _atom_head_kernel(x_ref, wd_ref, bd_ref, wo_ref, bo_ref, o_ref):
    """Fused: y = LayerNorm(GELU(x @ Wd + bd)) @ Wo' + bo'  (LN affine folded)."""
    x = x_ref[...].astype(jnp.bfloat16)

    # dense (nn.Linear(emb_dim, emb_dim)):  x @ Wd^T + bd   (Wd pre-transposed, bf16)
    h = jnp.dot(x, wd_ref[...], preferred_element_type=jnp.float32) + bd_ref[...]

    # exact (erf-based) GELU, matching torch.nn.GELU() default — f32 on the VPU/EUP
    inv_sqrt2 = jnp.float32(0.7071067811865476)
    h = 0.5 * h * (1.0 + jax.lax.erf(h * inv_sqrt2))

    # LayerNorm statistics over the feature dim (eps = 1e-5, PyTorch default), f32.
    # gamma/beta are folded into wo/bo by the wrapper, so only normalize here.
    mean = jnp.mean(h, axis=-1, keepdims=True)
    c = h - mean
    var = jnp.mean(c * c, axis=-1, keepdims=True)
    h = c * jax.lax.rsqrt(var + jnp.float32(1e-5))

    # output projection:  h @ (diag(gamma) @ Wo^T) + (beta @ Wo^T + bo)
    out = jnp.dot(h.astype(jnp.bfloat16), wo_ref[...],
                  preferred_element_type=jnp.float32) + bo_ref[...]
    o_ref[...] = out.astype(o_ref.dtype)


def _pick_tile_rows(n_rows, D, O_pad, x_bytes, out_bytes,
                    budget_bytes=40 * 1024 * 1024, max_tile=256):
    """Largest multiple-of-8 row tile that keeps double-buffered tiles in budget."""
    # Resident weights / biases (double-buffered by the pipeline, bf16 weights).
    fixed = 2 * (D * D * 2 + D * O_pad * 2 + D * 4 + O_pad * 4)
    # Per-row: x tile + out tile (double-buffered) + ~2x (row, D) f32 intermediates.
    per_row = 2 * (D * x_bytes + O_pad * out_bytes) + 2 * D * 4
    avail = max(budget_bytes - fixed, 8 * per_row)
    tm = (avail // per_row // 8) * 8
    tm = max(8, min(max_tile, tm))
    tm = min(tm, ((n_rows + 7) // 8) * 8)      # shrink for tiny inputs
    return max(8, int(tm))


def atom_head_forward(node_features, cls_features, params, masked_atom=None,
                      tile_rows=256):
    """Mirrors AtomHead.forward (norm='layer', activation_fn='gelu')."""
    wd_t, bd, gamma, beta, wo_t, bo = params   # all f32, see init_params
    D = node_features.shape[-1]
    O = wo_t.shape[-1]

    x = node_features
    if cls_features is not None:
        x = jnp.concatenate((x, cls_features), axis=1)
    if masked_atom is not None:
        # Matches the PyTorch module: indexing is applied AFTER the cls concat,
        # along dim 0 (int indices or boolean mask), i.e. node_features[masked_atom, :].
        x = x[masked_atom]

    lead_shape = x.shape[:-1]
    x2 = x.reshape(-1, D)                # keep the input dtype — no HBM upcast
    n_rows = x2.shape[0]

    # ---- offline parameter folding (f32), then cast MXU operands to bf16 ----
    wo_fold = wo_t * gamma.reshape(D, 1)              # fold LN gamma into Wo rows
    bo_fold = beta.reshape(1, D) @ wo_t + bo          # fold LN beta into bias

    O_pad = pl.cdiv(O, 128) * 128                     # lane-dense output stores
    if O_pad != O:
        wo_fold = jnp.pad(wo_fold, ((0, 0), (0, O_pad - O)))
        bo_fold = jnp.pad(bo_fold, ((0, 0), (0, O_pad - O)))

    wd_bf = wd_t.astype(jnp.bfloat16)
    wo_bf = wo_fold.astype(jnp.bfloat16)
    bd_f32 = bd.astype(jnp.float32)
    bo_f32 = bo_fold.astype(jnp.float32)

    # ---- row tiling: VMEM-budgeted multiple of 8, ragged tail masked by Pallas ----
    tm = _pick_tile_rows(n_rows, D, O_pad,
                         x_bytes=x2.dtype.itemsize,
                         out_bytes=x2.dtype.itemsize,
                         max_tile=int(tile_rows))
    grid = (pl.cdiv(n_rows, tm),)

    out = pl.pallas_call(
        _atom_head_kernel,
        out_shape=jax.ShapeDtypeStruct((n_rows, O_pad), x2.dtype),
        grid_spec=pltpu.PrefetchScalarGridSpec(
            num_scalar_prefetch=0,
            grid=grid,
            in_specs=[
                pl.BlockSpec((tm, D), lambda i: (i, 0)),       # x tile
                pl.BlockSpec((D, D), lambda i: (0, 0)),        # dense W^T (bf16)
                pl.BlockSpec((1, D), lambda i: (0, 0)),        # dense bias (f32)
                pl.BlockSpec((D, O_pad), lambda i: (0, 0)),    # folded out W^T (bf16)
                pl.BlockSpec((1, O_pad), lambda i: (0, 0)),    # folded out bias (f32)
            ],
            out_specs=pl.BlockSpec((tm, O_pad), lambda i: (i, 0)),
        ),
        compiler_params=pltpu.CompilerParams(
            dimension_semantics=("parallel",),
            vmem_limit_bytes=64 * 1024 * 1024),
    )(x2, wd_bf, bd_f32, wo_bf, bo_f32)

    if O_pad != O:
        out = out[:, :O]
    return out.reshape(lead_shape + (O,))


def init_params(key, emb_dim, output_dim):
    """Deterministic synthetic parameters (shapes match AtomHead.__init__)."""
    k1, k2, k3, k4, k5 = jax.random.split(key, 5)
    # nn.Linear(emb_dim, emb_dim)
    wd = jax.random.normal(k1, (emb_dim, emb_dim), jnp.float32) * 0.05
    bd = jax.random.normal(k2, (1, emb_dim), jnp.float32) * 0.05
    # LayerNorm(emb_dim) — perturbed from fresh init so the gamma/beta folding is exercised
    gamma = 1.0 + 0.1 * jax.random.normal(k4, (1, emb_dim), jnp.float32)
    beta = 0.1 * jax.random.normal(k5, (1, emb_dim), jnp.float32)
    # nn.Linear(emb_dim, output_dim, bias=False).weight  -> [output_dim, emb_dim]
    wo = jax.random.normal(k3, (output_dim, emb_dim), jnp.float32) * 0.05
    # self.bias = zeros(output_dim)
    bo = jnp.zeros((1, output_dim), jnp.float32)
    # pre-transpose weights so the kernel does plain x @ W
    return (wd.T, bd, gamma, beta, wo.T, bo)


def _reference(node_features, cls_features, params):
    """Pure-f32 reference matching the PyTorch module (no folding, no bf16)."""
    wd_t, bd, gamma, beta, wo_t, bo = params
    x = jnp.concatenate((node_features, cls_features), axis=1) \
        if cls_features is not None else node_features
    h = x.astype(jnp.float32) @ wd_t + bd
    h = 0.5 * h * (1.0 + jax.lax.erf(h * 0.7071067811865476))
    mean = jnp.mean(h, axis=-1, keepdims=True)
    var = jnp.mean((h - mean) ** 2, axis=-1, keepdims=True)
    h = (h - mean) * jax.lax.rsqrt(var + 1e-5) * gamma + beta
    return h @ wo_t + bo


if __name__ == "__main__":
    emb_dim, output_dim = 32, 16
    batch, seq = 2, 8

    key = jax.random.PRNGKey(0)
    k_node, k_cls, k_par = jax.random.split(key, 3)
    node_features = jax.random.normal(k_node, (batch, seq, emb_dim), jnp.float32)
    cls_features = jax.random.normal(k_cls, (batch, 1, emb_dim), jnp.float32)
    params = init_params(k_par, emb_dim, output_dim)

    out = atom_head_forward(node_features, cls_features, params, masked_atom=None)
    out = jax.block_until_ready(out)

    ref = _reference(node_features, cls_features, params)
    assert out.shape == (batch, seq + 1, output_dim), out.shape
    # bf16 MXU operands drift slightly from the pure-f32 reference; GELU/LN
    # statistics are still f32, so a few-percent tolerance is ample.
    assert jnp.allclose(out, ref, atol=3e-2, rtol=3e-2), "mismatch vs reference"

    print("KERNEL_OK")
</pallas_src>

<mosaic_0001>
module attributes {stable_mosaic.version = 11 : i64} {
  func.func @_atom_head_kernel(%arg0: i32, %arg1: memref<24x32xf32, #tpu.memory_space<vmem>>, %arg2: memref<32x32xbf16, #tpu.memory_space<vmem>>, %arg3: memref<1x32xf32, #tpu.memory_space<vmem>>, %arg4: memref<32x128xbf16, #tpu.memory_space<vmem>>, %arg5: memref<1x128xf32, #tpu.memory_space<vmem>>, %arg6: memref<24x128xf32, #tpu.memory_space<vmem>>) attributes {dimension_semantics = [#tpu.dimension_semantics<parallel>], iteration_bounds = array<i64: 1>, scalar_prefetch = 0 : i64, scratch_operands = 0 : i64, tpu.core_type = #tpu.core_type<tc>, window_params = [{transform_indices = @transform_0, window_bounds = array<i64: 24, 32>}, {pipeline_mode = #tpu.pipeline_mode<synchronous>, transform_indices = @transform_1, window_bounds = array<i64: 32, 32>}, {pipeline_mode = #tpu.pipeline_mode<synchronous>, transform_indices = @transform_2, window_bounds = array<i64: 1, 32>}, {pipeline_mode = #tpu.pipeline_mode<synchronous>, transform_indices = @transform_3, window_bounds = array<i64: 32, 128>}, {pipeline_mode = #tpu.pipeline_mode<synchronous>, transform_indices = @transform_4, window_bounds = array<i64: 1, 128>}, {transform_indices = @transform_5, window_bounds = array<i64: 24, 128>}]} {
    %c0 = arith.constant 0 : index
    %c0_0 = arith.constant 0 : index
    %0 = vector.load %arg1[%c0, %c0_0] : memref<24x32xf32, #tpu.memory_space<vmem>>, vector<24x32xf32>
    %1 = arith.truncf %0 : vector<24x32xf32> to vector<24x32xbf16>
    %c0_1 = arith.constant 0 : index
    %c0_2 = arith.constant 0 : index
    %2 = vector.load %arg2[%c0_1, %c0_2] : memref<32x32xbf16, #tpu.memory_space<vmem>>, vector<32x32xbf16>
    %cst = arith.constant dense<0.000000e+00> : vector<24x32xf32>
    %3 = tpu.matmul %1, %2, %cst {dimension_numbers = #tpu.dot_dimension_numbers<[1], [0], [0], [1], [0, 0, 1, 1], [], []>} : vector<24x32xbf16>, vector<32x32xbf16>, vector<24x32xf32> -> vector<24x32xf32>
    %c0_3 = arith.constant 0 : index
    %c0_4 = arith.constant 0 : index
    %4 = vector.load %arg3[%c0_3, %c0_4] : memref<1x32xf32, #tpu.memory_space<vmem>>, vector<1x32xf32>
    %5 = vector.broadcast %4 : vector<1x32xf32> to vector<24x32xf32>
    %6 = arith.addf %3, %5 : vector<24x32xf32>
    %cst_5 = arith.constant 5.000000e-01 : f32
    %7 = vector.broadcast %cst_5 : f32 to vector<24x32xf32>
    %8 = arith.mulf %7, %6 : vector<24x32xf32>
    %cst_6 = arith.constant 0.707106769 : f32
    %9 = vector.broadcast %cst_6 : f32 to vector<24x32xf32>
    %10 = arith.mulf %6, %9 : vector<24x32xf32>
    %11 = math.erf %10 : vector<24x32xf32>
    %cst_7 = arith.constant 1.000000e+00 : f32
    %12 = vector.broadcast %cst_7 : f32 to vector<24x32xf32>
    %13 = arith.addf %12, %11 : vector<24x32xf32>
    %14 = arith.mulf %8, %13 : vector<24x32xf32>
    %cst_8 = arith.constant dense<0.000000e+00> : vector<24xf32>
    %15 = vector.multi_reduction <add>, %14, %cst_8 [1] : vector<24x32xf32> to vector<24xf32>
    %16 = vector.shape_cast %15 : vector<24xf32> to vector<24x1xf32>
    %cst_9 = arith.constant 3.200000e+01 : f32
    %17 = vector.broadcast %cst_9 : f32 to vector<24x1xf32>
    %18 = arith.divf %16, %17 : vector<24x1xf32>
    %19 = vector.broadcast %18 : vector<24x1xf32> to vector<24x32xf32>
    %20 = arith.subf %14, %19 : vector<24x32xf32>
    %21 = arith.mulf %20, %20 : vector<24x32xf32>
    %cst_10 = arith.constant dense<0.000000e+00> : vector<24xf32>
    %22 = vector.multi_reduction <add>, %21, %cst_10 [1] : vector<24x32xf32> to vector<24xf32>
    %23 = vector.shape_cast %22 : vector<24xf32> to vector<24x1xf32>
    %cst_11 = arith.constant 3.200000e+01 : f32
    %24 = vector.broadcast %cst_11 : f32 to vector<24x1xf32>
    %25 = arith.divf %23, %24 : vector<24x1xf32>
    %cst_12 = arith.constant 9.99999974E-6 : f32
    %26 = vector.broadcast %cst_12 : f32 to vector<24x1xf32>
    %27 = arith.addf %25, %26 : vector<24x1xf32>
    %28 = math.rsqrt %27 : vector<24x1xf32>
    %29 = vector.broadcast %28 : vector<24x1xf32> to vector<24x32xf32>
    %30 = arith.mulf %20, %29 : vector<24x32xf32>
    %31 = arith.truncf %30 : vector<24x32xf32> to vector<24x32xbf16>
    %c0_13 = arith.constant 0 : index
    %c0_14 = arith.constant 0 : index
    %32 = vector.load %arg4[%c0_13, %c0_14] : memref<32x128xbf16, #tpu.memory_space<vmem>>, vector<32x128xbf16>
    %cst_15 = arith.constant dense<0.000000e+00> : vector<24x128xf32>
    %33 = tpu.matmul %31, %32, %cst_15 {dimension_numbers = #tpu.dot_dimension_numbers<[1], [0], [0], [1], [0, 0, 1, 1], [], []>} : vector<24x32xbf16>, vector<32x128xbf16>, vector<24x128xf32> -> vector<24x128xf32>
    %c0_16 = arith.constant 0 : index
    %c0_17 = arith.constant 0 : index
    %34 = vector.load %arg5[%c0_16, %c0_17] : memref<1x128xf32, #tpu.memory_space<vmem>>, vector<1x128xf32>
    %35 = vector.broadcast %34 : vector<1x128xf32> to vector<24x128xf32>
    %36 = arith.addf %33, %35 : vector<24x128xf32>
    %c0_18 = arith.constant 0 : index
    %c0_19 = arith.constant 0 : index
    %37 = vector.load %arg6[%c0_18, %c0_19] : memref<24x128xf32, #tpu.memory_space<vmem>>, vector<24x128xf32>
    tpu.vector_store %arg6[%c0_18, %c0_19], %36 {strides = array<i32>} : memref<24x128xf32, #tpu.memory_space<vmem>>, vector<24x128xf32>,
    return
  }
  func.func @transform_0(%arg0: i32) -> (i32, i32) {
    %c0_i32 = arith.constant 0 : i32
    %c0_i32_0 = arith.constant 0 : i32
    return %arg0, %c0_i32 : i32, i32
  }
  func.func @transform_1(%arg0: i32) -> (i32, i32) {
    %c0_i32 = arith.constant 0 : i32
    %c0_i32_0 = arith.constant 0 : i32
    %c0_i32_1 = arith.constant 0 : i32
    return %c0_i32, %c0_i32_0 : i32, i32
  }
  func.func @transform_2(%arg0: i32) -> (i32, i32) {
    %c0_i32 = arith.constant 0 : i32
    %c0_i32_0 = arith.constant 0 : i32
    %c0_i32_1 = arith.constant 0 : i32
    return %c0_i32, %c0_i32_0 : i32, i32
  }
  func.func @transform_3(%arg0: i32) -> (i32, i32) {
    %c0_i32 = arith.constant 0 : i32
    %c0_i32_0 = arith.constant 0 : i32
    %c0_i32_1 = arith.constant 0 : i32
    return %c0_i32, %c0_i32_0 : i32, i32
  }
  func.func @transform_4(%arg0: i32) -> (i32, i32) {
    %c0_i32 = arith.constant 0 : i32
    %c0_i32_0 = arith.constant 0 : i32
    %c0_i32_1 = arith.constant 0 : i32
    return %c0_i32, %c0_i32_0 : i32, i32
  }
  func.func @transform_5(%arg0: i32) -> (i32, i32) {
    %c0_i32 = arith.constant 0 : i32
    %c0_i32_0 = arith.constant 0 : i32
    return %arg0, %c0_i32 : i32, i32
  }
}

</mosaic_0001>

<bundles_post_ra>
// kernel: tpu_custom_call.1
= control target key start
LH: loop header
LB: loop body
LE: loop exit
PB: predicated region body
PF: predicated region fallthrough
CT: control target
= control target key end

     0   :  { %10 = vsyncpa [#allocation3], 0  ;;  %s653_s0 = inlined_call_operand.hbm [shape: f32[18,32], index: 0, kind: input, shape index: {}]   ;;  %s654_s1 = inlined_call_operand.hbm [shape: bf16[32,32], index: 1, kind: input, shape index: {}]   ;;  %s655_s2 = inlined_call_operand.hbm [shape: f32[1,32], index: 2, kind: input, shape index: {}]   ;;  %s656_s3 = inlined_call_operand.hbm [shape: bf16[32,128], index: 3, kind: input, shape index: {}]   ;;  %s657_s4 = inlined_call_operand.hbm [shape: f32[1,128], index: 4, kind: input, shape index: {}]   ;;  %s658_s5 = inlined_call_operand.hbm [shape: f32[18,128], index: 5, kind: output, shape index: {}]  }
   0x1   :  { %11 = vsyncpa [#allocation6], 0 }
   0x2   :  { %12 = vsyncpa [#allocation9], 0 }
   0x3   :  { %13 = vsyncpa [#allocation4], 0  ;;  %s525_s18 = smov [#allocation5]   ;;  %s385_s22 = scalar_lea.hbm %s654_s1, 256 }
   0x4   :  { %s31_s19 = sshll.u32 %s525_s18, 4  ;;  %p386_p0 = scmp.ne.s32.totalorder %s654_s1, %s385_s22  ;;  %s32_s19 = int_to_ptr.vmem [resolvable:$true] %s31_s19 }
   0x5   :  { %p389_p1 = scmp.lt.u32.totalorder %s385_s22, %s654_s1 }
   0x7   :  { %p391_p2 = pnand %p389_p1, %p386_p0 }
   0x9   :  { %394 = shalt.err (!%p391_p2)
}
   0xa   :  { %s395_s27 = scalar_lea.vmem %s32_s19, 256  ;;  %p400_p4 = scmp.lt.s32.totalorder %s32_s19, %s32_s19 }
   0xb   :  { %p396_p3 = scmp.ne.s32.totalorder %s32_s19, %s395_s27  ;;  %p401_p5 = scmp.lt.s32.totalorder %s395_s27, %s395_s27 }
   0xd   :  { %p402_p6 = por %p401_p5, %p400_p4 }
   0xf   :  { %p403_p7 = pnand %p402_p6, %p396_p3 }
  0x11   :  { %406 = shalt.err (!%p403_p7)
}
  0x12   :  { %s526_s28 = smov 64   ;;  %s527_s29 = smov 4  }
  0x13   :  { %37 = dma.hbm_to_vmem [thread:$0]  %s654_s1, 256, %s32_s19, [#allocation6], %s526_s28, %s526_s28, %s527_s29  }
  0x14   :  { %s528_s7 = smov [#allocation8]   ;;  %s529_s9 = smov [#allocation2]  }
  0x15   :  { %s53_s8 = sshll.u32 %s528_s7, 4  ;;  %s19_s10 = sshll.u32 %s529_s9, 4  ;;  %s54_s8 = int_to_ptr.vmem [resolvable:$true] %s53_s8  ;;  %s20_s10 = int_to_ptr.vmem [resolvable:$true] %s19_s10 }
  0x16   :  { %s407_s13 = scalar_lea.hbm %s656_s3, 256 }
  0x17   :  { %p408_p8 = scmp.ne.s32.totalorder %s656_s3, %s407_s13  ;;  %p411_p9 = scmp.lt.u32.totalorder %s407_s13, %s656_s3 }
  0x19   :  { %p413_p10 = pnand %p411_p9, %p408_p8 }
  0x1b   :  { %416 = shalt.err (!%p413_p10)
}
  0x1c   :  { %s417_s1 = scalar_lea.vmem %s54_s8, 256  ;;  %p422_p12 = scmp.lt.s32.totalorder %s54_s8, %s54_s8 }
  0x1d   :  { %p418_p11 = scmp.ne.s32.totalorder %s54_s8, %s417_s1  ;;  %p423_p13 = scmp.lt.s32.totalorder %s417_s1, %s417_s1 }
  0x1f   :  { %p424_p0 = por %p423_p13, %p422_p12 }
  0x21   :  { %p425_p1 = pnand %p424_p0, %p418_p11 }
  0x23   :  { %428 = shalt.err (!%p425_p1)
}
  0x24   :  { %59 = dma.hbm_to_vmem [thread:$0]  %s656_s3, 256, %s54_s8, [#allocation9], %s526_s28, %s526_s28, %s527_s29  }
  0x25   :  { %s429_s22 = scalar_lea.hbm %s653_s0, 384 }
  0x26   :  { %p430_p2 = scmp.ne.s32.totalorder %s653_s0, %s429_s22  ;;  %p433_p3 = scmp.lt.u32.totalorder %s429_s22, %s653_s0 }
  0x28   :  { %p435_p4 = pnand %p433_p3, %p430_p2 }
  0x2a   :  { %438 = shalt.err (!%p435_p4)
}
  0x2b   :  { %s439_s27 = scalar_lea.vmem %s20_s10, 384  ;;  %p444_p6 = scmp.lt.s32.totalorder %s20_s10, %s20_s10 }
  0x2c   :  { %p440_p5 = scmp.ne.s32.totalorder %s20_s10, %s439_s27  ;;  %p445_p7 = scmp.lt.s32.totalorder %s439_s27, %s439_s27 }
  0x2e   :  { %p446_p8 = por %p445_p7, %p444_p6 }
  0x30   :  { %p447_p9 = pnand %p446_p8, %p440_p5 }
  0x32   :  { %450 = shalt.err (!%p447_p9)
}
  0x33   :  { %s530_s3 = smov 128   ;;  %s531_s28 = smov 8  }
  0x34   :  { %25 = dma.hbm_to_vmem [thread:$0]  %s653_s0, 384, %s20_s10, [#allocation3], %s530_s3, %s530_s3, %s531_s28  }
  0x35   :  { %s532_s6 = smov [#allocation7]   ;;  %s533_s8 = smov [#allocation10]  }
  0x36   :  { %s44_s7 = sshll.u32 %s532_s6, 4  ;;  %s66_s9 = sshll.u32 %s533_s8, 4  ;;  %s45_s7 = int_to_ptr.vmem [resolvable:$true] %s44_s7  ;;  %s67_s9 = int_to_ptr.vmem [resolvable:$true] %s66_s9 }
  0x37   :  { %s451_s13 = scalar_lea.hbm %s655_s2, 16 }
  0x38   :  { %p452_p10 = scmp.ne.s32.totalorder %s655_s2, %s451_s13  ;;  %p455_p11 = scmp.lt.u32.totalorder %s451_s13, %s655_s2 }
  0x3a   :  { %p457_p12 = pnand %p455_p11, %p452_p10 }
  0x3c   :  { %460 = shalt.err (!%p457_p12)
}
  0x3d   :  { %s461_s0 = scalar_lea.vmem %s45_s7, 16  ;;  %s465_s10 = scalar_lea.vmem %s45_s7, 32 }
  0x3e   :  { %p462_p13 = scmp.ne.s32.totalorder %s45_s7, %s461_s0  ;;  %p466_p0 = scmp.lt.s32.totalorder %s45_s7, %s45_s7 }
  0x3f   :  { %p467_p1 = scmp.lt.s32.totalorder %s465_s10, %s461_s0 }
  0x41   :  { %p468_p2 = por %p467_p1, %p466_p0 }
  0x43   :  { %p469_p3 = pnand %p468_p2, %p462_p13 }
  0x45   :  { %472 = shalt.err (!%p469_p3)
}
  0x46   :  { %47 = dma.hbm_to_vmem [thread:$0]  %s655_s2, 16, %s45_s7, [#allocation6]  }
  0x47   :  { %s473_s21 = scalar_lea.hbm %s657_s4, 16 }
  0x48   :  { %p474_p4 = scmp.ne.s32.totalorder %s657_s4, %s473_s21  ;;  %p477_p5 = scmp.lt.u32.totalorder %s473_s21, %s657_s4 }
  0x4a   :  { %p479_p6 = pnand %p477_p5, %p474_p4 }
  0x4c   :  { %482 = shalt.err (!%p479_p6)
}
  0x4d   :  { %s483_s26 = scalar_lea.vmem %s67_s9, 16  ;;  %s487_s27 = scalar_lea.vmem %s67_s9, 32 }
  0x4e   :  { %p484_p7 = scmp.ne.s32.totalorder %s67_s9, %s483_s26  ;;  %p488_p8 = scmp.lt.s32.totalorder %s67_s9, %s67_s9 }
  0x4f   :  { %p489_p9 = scmp.lt.s32.totalorder %s487_s27, %s483_s26 }
  0x51   :  { %p490_p10 = por %p489_p9, %p488_p8 }
  0x53   :  { %p491_p11 = pnand %p490_p10, %p484_p7 }
  0x55   :  { %494 = shalt.err (!%p491_p11)
}
  0x56   :  { %69 = dma.hbm_to_vmem [thread:$0]  %s657_s4, 16, %s67_s9, [#allocation9]  }
  0x57   :  { %517 = dma.done.wait [#allocation3], 384  }
  0x58   :  { %518 = vsyncadd [#allocation3], 4294966912 }
  0x59   :  { %519 = dma.done.wait [#allocation6], 272  }
  0x5a   :  { %520 = vsyncadd [#allocation6], 4294967024 }
  0x5b   :  { %521 = dma.done.wait [#allocation9], 272  }
  0x5c   :  { %522 = vsyncadd [#allocation9], 4294967024  ;;  %v369_v0 = vld [vmem:[#allocation5] sm:$0xff]   ;;  %v370_v1 = vld [vmem:[#allocation5 + $0x8] sm:$0xff]   ;;  %vm114_vm0 = vcmask 261120   ;;  %s534_s4 = smov [#allocation11]  }
  0x5d   :  { %343 = vmatprep.subr.bf16.mxu0 %v369_v0  ;;  %v86_v2 = vld [vmem:[#allocation2] sm:$0xff]  ;;  %v87_v3 = vld [vmem:[#allocation2 + $0x8] sm:$0xff]  ;;  %v88_v4 = vld [vmem:[#allocation2 + $0x10] sm:$0xff]  ;;  %s311_s30 = sshll.u32 %s534_s4, 4  ;;  %s312_s30 = int_to_ptr.vmem [resolvable:$true] %s311_s30 }
  0x5e   :  { %344 = vmatpush3.bf16.msra.mxu0 %v369_v0  ;;  %v89_v5 = vpack.c.bf16 %v87_v3, %v86_v2  ;;  %v90_v6 = vpack.c.bf16 %v88_v4, %v88_v4  ;;  %v325_v7 = vld [vmem:[#allocation7] ss:$0 sm:$0xff]  ;;  %v371_v48 = vld [vmem:[#allocation8] sm:$0xff]   ;;  %v372_v49 = vld [vmem:[#allocation8 + $0x8] sm:$0xff]   ;;  %s495_s6 = scalar_lea.vmem %s312_s30, 384  ;;  %p500_p13 = scmp.lt.s32.totalorder %s312_s30, %s312_s30 }
  0x5f   :  { %345 = vmatprep.subr.bf16.mxu0 %v370_v1  ;;  %351 = vmatprep.subr.bf16.mxu1 %v371_v48  ;;  %v330_v3 = vld [vmem:[#allocation10] ss:$0 sm:$0xff]  ;;  %p496_p12 = scmp.ne.s32.totalorder %s312_s30, %s495_s6  ;;  %p501_p0 = scmp.lt.s32.totalorder %s495_s6, %s495_s6 }
  0x60   :  { %347 = vmatprep.mubr.msk.bf16.mxu0 %vm114_vm0, %v89_v5  ;;  %352 = vmatpush3.bf16.msra.mxu1 %v371_v48 }
  0x61   :  { %353 = vmatprep.subr.bf16.mxu1 %v372_v49  ;;  %p502_p1 = por %p501_p0, %p500_p13 }
  0x62   :  { %346 = vmatpush3.bf16.msra.mxu0 %v370_v1 }
  0x63   :  { %p503_p2 = pnand %p502_p1, %p496_p12 }
  0x64   :  { %354 = vmatpush3.bf16.msra.mxu1 %v372_v49 }
  0x65   :  { %348 = vmatmul.mubr.msk.bf16.vlgmr.msra.gmra.mrb[0].mxu0 %vm114_vm0, %v90_v6 }
 0x138   :  { %v349_v8 = vpop.f32.mrb[0].mxu0 }
 0x139   :  { %v164_v9 = vadd.f32 %v349_v8, %v325_v7  ;;  %v155_v10 = vpop.f32.mrb[1].mxu0 }
 0x13a   :  { %v156_v11 = vadd.f32 %v325_v7, %v155_v10  ;;  %v350_v12 = vpop.f32.mrb[2].mxu0 }
 0x13b   :  { %v174_v13 = vmul.f32 0.70710677, %v164_v9  ;;  %v158_v14 = vpop.f32.mrb[3].mxu0  ;;  %v171_v20 = vmul.f32 0.5, %v164_v9 }
 0x13c   :  { %v172_v15 = vmul.f32 0.70710677, %v156_v11  ;;  %v159_v16 = vadd.f32 %v325_v7, %v158_v14  ;;  %v169_v22 = vmul.f32 0.5, %v156_v11 }
 0x13d   :  { %373 = verf.f32 %v174_v13 }
 0x13e   :  { %375 = verf.f32 %v172_v15  ;;  %v173_v17 = vmul.f32 0.70710677, %v159_v16  ;;  %v170_v26 = vmul.f32 0.5, %v159_v16 }
 0x140   :  { %377 = verf.f32 %v173_v17 }
 0x147   :  { %v374_v18 = vpop.eup %373 }
 0x148   :  { %v376_v19 = vpop.eup %375  ;;  %v180_v21 = vadd.f32 1.0, %v374_v18 }
 0x149   :  { %v178_v23 = vadd.f32 1.0, %v376_v19 }
 0x14a   :  { %v378_v24 = vpop.eup %377  ;;  %v183_v25 = vmul.f32 %v180_v21, %v171_v20 }
 0x14b   :  { %v181_v27 = vmul.f32 %v178_v23, %v169_v22  ;;  %v179_v28 = vadd.f32 1.0, %v378_v24 }
 0x14c   :  { %v190_v29 = vsel %vm114_vm0, %v183_v25, 0.0 }
 0x14d   :  { %191 = vadd.xlane.f32.xlu1 %v190_v29  ;;  %v184_v30 = vsel %vm114_vm0, %v181_v27, 0.0  ;;  %v182_v31 = vmul.f32 %v179_v28, %v170_v26 }
 0x14e   :  { %185 = vadd.xlane.f32.xlu0 %v184_v30 }
 0x14f   :  { %v187_v32 = vsel %vm114_vm0, %v182_v31, 0.0 }
 0x152   :  { %188 = vadd.xlane.f32.xlu0 %v187_v32 }
 0x1da   :  { %v192_v33 = vpop.xlane.xlu1 %191 }
 0x1db   :  { %v196_v34 = vmul.f32 0.03125, %v192_v33  ;;  %v186_v35 = vpop.xlane.xlu0 %185 }
 0x1dc   :  { %v194_v36 = vmul.f32 0.03125, %v186_v35 }
 0x1dd   :  { %v199_v37 = vsub.f32 %v183_v25, %v196_v34 }
 0x1de   :  { %v197_v38 = vsub.f32 %v181_v27, %v194_v36 }
 0x1df   :  { %v189_v39 = vpop.xlane.xlu0 %188  ;;  %v202_v44 = vmul.f32 %v199_v37, %v199_v37 }
 0x1e0   :  { %v195_v40 = vmul.f32 0.03125, %v189_v39  ;;  %v200_v41 = vmul.f32 %v197_v38, %v197_v38 }
 0x1e1   :  { %v209_v46 = vsel %vm114_vm0, %v202_v44, 0.0 }
 0x1e2   :  { %v198_v42 = vsub.f32 %v182_v31, %v195_v40  ;;  %v203_v43 = vsel %vm114_vm0, %v200_v41, 0.0 }
 0x1e3   :  { %204 = vadd.xlane.f32.xlu1 %v203_v43 }
 0x1e4   :  { %v201_v45 = vmul.f32 %v198_v42, %v198_v42 }
 0x1e6   :  { %v206_v47 = vsel %vm114_vm0, %v201_v45, 0.0 }
 0x1e7   :  { %210 = vadd.xlane.f32.xlu1 %v209_v46  ;;  %207 = vadd.xlane.f32.xlu0 %v206_v47 }
 0x270   :  { %v205_v50 = vpop.xlane.xlu1 %204 }
 0x271   :  { %v212_v51 = vmul.f32 0.03125, %v205_v50 }
 0x273   :  { %v215_v52 = vadd.f32 1e-05, %v212_v51 }
 0x274   :  { %v211_v53 = vpop.xlane.xlu1 %210  ;;  %v208_v54 = vpop.xlane.xlu0 %207 }
 0x275   :  { %v214_v55 = vmul.f32 0.03125, %v211_v53  ;;  %v213_v56 = vmul.f32 0.03125, %v208_v54  ;;  %379 = vrsqrt.f32 %v215_v52 }
 0x277   :  { %v217_v57 = vadd.f32 1e-05, %v214_v55  ;;  %v216_v58 = vadd.f32 1e-05, %v213_v56 }
 0x279   :  { %381 = vrsqrt.f32 %v217_v57 }
 0x27a   :  { %383 = vrsqrt.f32 %v216_v58 }
 0x27f   :  { %v380_v59 = vpop.eup %379 }
 0x280   :  { %v221_v63 = vmul.f32 %v380_v59, %v197_v38 }
 0x283   :  { %v382_v60 = vpop.eup %381 }
 0x284   :  { %v384_v61 = vpop.eup %383  ;;  %v223_v62 = vmul.f32 %v382_v60, %v199_v37 }
 0x285   :  { %v222_v0 = vmul.f32 %v384_v61, %v198_v42 }
 0x286   :  { %v225_v1 = vpack.c.bf16 %v223_v62, %v223_v62 }
 0x287   :  { %v224_v2 = vpack.c.bf16 %v222_v0, %v221_v63 }
 0x289   :  { %355 = vmatprep.mubr.msk.bf16.mxu1 %vm114_vm0, %v224_v2 }
 0x28a   :  { %356 = vmatmul.mubr.msk.bf16.vlgmr.msra.gmra.mrb[0].mxu1 %vm114_vm0, %v225_v1 }
 0x35d   :  { %v357_v4 = vpop.f32.mrb[0].mxu1 }
 0x35e   :  { %v298_v5 = vadd.f32 %v357_v4, %v330_v3  ;;  %v289_v6 = vpop.f32.mrb[1].mxu1 }
 0x35f   :  { %v290_v7 = vadd.f32 %v330_v3, %v289_v6  ;;  %v358_v8 = vpop.f32.mrb[2].mxu1 }
 0x360   :  { %305 = vst [vmem:[#allocation11 + $0x10] sm:$0xff] %v298_v5  ;;  %v292_v9 = vpop.f32.mrb[3].mxu1 }
 0x361   :  { %303 = vst [vmem:[#allocation11] sm:$0xff] %v290_v7  ;;  %v293_v10 = vadd.f32 %v330_v3, %v292_v9 }
 0x363   :  { %304 = vst [vmem:[#allocation11 + $0x8] sm:$0xff] %v293_v10 }
 0x364   :  { %506 = shalt.err (!%p503_p2)
}
 0x365   :  { %s507_s9 = scalar_lea.hbm %s658_s5, 384 }
 0x366   :  { %p508_p3 = scmp.ne.s32.totalorder %s658_s5, %s507_s9  ;;  %p511_p4 = scmp.lt.u32.totalorder %s507_s9, %s658_s5 }
 0x368   :  { %p513_p5 = pnand %p511_p4, %p508_p3 }
 0x36a   :  { %516 = shalt.err (!%p513_p5)
}
 0x36b   :  { %317 = dma.vmem_to_hbm [thread:$0]  %s312_s30, 384, %s658_s5, [#allocation4], %s530_s3, %s530_s3, %s531_s28  }
 0x36c   :  { %523 = dma.done.wait [#allocation4], 384  }
 0x36d   :  { %524 = vsyncadd [#allocation4], 4294966912 }
 0x36e   :  { %321 = vsyncpa [#allocation3], 1 }
 0x36f   :  { %322 = vsyncpa [#allocation6], 1 }
 0x370   :  { %323 = vsyncpa [#allocation9], 1 }
 0x371   :  { %324 = vsyncpa [#allocation4], 1 }

</bundles_post_ra>
